<compile_context>
chip_gen: v5e
topology: v5e:2x2
jax: 0.10.0
libtpu: 0.0.40
codegen_flags: <defaults>
</compile_context>

<pallas_src>
import functools

import jax
import jax.numpy as jnp
from jax.experimental import pallas as pl
from jax.experimental.pallas import tpu as pltpu

LANE = 128
SUBLANE = 8
CHUNK_ROWS = 256            # 256x128 f32 chunk = 128 KiB (32 vregs) per streamed array
MAX_BLOCK_ROWS = 8192       # (8192, 128) f32 block = 4 MiB per input
SPLIT_ROWS = 1024           # above this, force >=2 grid steps (v7x megacore)
VMEM_LIMIT_BYTES = 48 << 20  # explicit: > v5e's 16 MiB default, < v7x's 64 MiB physical


def _round_up(x, m):
    return (x + m - 1) // m * m


def _to_2d(x):
    """Flatten to 1-D and view as (rows, 128); zero-pad only if numel % 128 != 0."""
    x = x.reshape(-1)
    pad = _round_up(x.shape[0], LANE) - x.shape[0]
    if pad:
        # Ragged path only: one extra copy of the input (see header note).
        x = jnp.pad(x, (0, pad))
    return x.reshape(-1, LANE)


def _block_rows(total_rows):
    # Aim for >=2 grid steps when there's enough work (both TensorCores on v7x),
    # keep blocks a multiple of CHUNK_ROWS, and cap the double-buffered working set
    # (~16-18 MiB at 8192 rows f32) comfortably under the VMEM limit.
    target = -(-total_rows // 2) if total_rows > SPLIT_ROWS else total_rows
    return min(MAX_BLOCK_ROWS, _round_up(target, CHUNK_ROWS))


def _l1_sum_kernel(gt_ref, pr_ref, out_ref, *, block_rows, valid_rows):
    num_blocks = pl.cdiv(valid_rows, block_rows)
    n_chunks = block_rows // CHUNK_ROWS
    zero = jnp.zeros((SUBLANE, LANE), jnp.float32)

    def chunk(start, acc, row0=None):
        g = gt_ref[pl.ds(start, CHUNK_ROWS), :].astype(jnp.float32)
        p = pr_ref[pl.ds(start, CHUNK_ROWS), :].astype(jnp.float32)
        d = jnp.abs(g - p)
        if row0 is not None:  # only the single partially-valid tail chunk pays for this
            row = row0 + jax.lax.broadcasted_iota(jnp.int32, (CHUNK_ROWS, LANE), 0)
            d = jnp.where(row < valid_rows, d, 0.0)   # select, not multiply
        return acc + d.reshape(CHUNK_ROWS // SUBLANE, SUBLANE, LANE).sum(axis=0)

    def interior_body(c, acc):
        return chunk(pl.multiple_of(c * CHUNK_ROWS, CHUNK_ROWS), acc)

    def full_block():
        out_ref[0, :, :] = jax.lax.fori_loop(0, n_chunks, interior_body, zero, unroll=True)

    def tail_block():
        last_start = (num_blocks - 1) * block_rows
        rows_left = valid_rows - last_start
        n_full = rows_left // CHUNK_ROWS
        acc = zero
        if n_full:
            acc = jax.lax.fori_loop(0, n_full, interior_body, acc, unroll=True)
        if rows_left % CHUNK_ROWS:
            acc = chunk(n_full * CHUNK_ROWS, acc, row0=last_start + n_full * CHUNK_ROWS)
        out_ref[0, :, :] = acc

    if valid_rows % block_rows == 0:      # static: no ragged tail anywhere
        full_block()
    elif num_blocks == 1:                 # static: the only block is the ragged one
        tail_block()
    else:
        last = num_blocks - 1
        pl.when(pl.program_id(0) != last)(full_block)
        pl.when(pl.program_id(0) == last)(tail_block)


def _l1_masked_kernel(gt_ref, pr_ref, m_ref, sum_ref, cnt_ref, *, block_rows, valid_rows):
    num_blocks = pl.cdiv(valid_rows, block_rows)
    n_chunks = block_rows // CHUNK_ROWS
    zero = jnp.zeros((SUBLANE, LANE), jnp.float32)

    def chunk(start, carry, row0=None):
        acc_s, acc_c = carry
        g = gt_ref[pl.ds(start, CHUNK_ROWS), :].astype(jnp.float32)
        p = pr_ref[pl.ds(start, CHUNK_ROWS), :].astype(jnp.float32)
        sel = m_ref[pl.ds(start, CHUNK_ROWS), :] != 0
        if row0 is not None:
            row = row0 + jax.lax.broadcasted_iota(jnp.int32, (CHUNK_ROWS, LANE), 0)
            sel = jnp.logical_and(sel, row < valid_rows)
        # Select (not multiply): de-selected / out-of-bounds elements never contribute,
        # matching torch boolean indexing even if they hold NaN/Inf.
        d = jnp.where(sel, jnp.abs(g - p), 0.0)
        w = sel.astype(jnp.float32)
        acc_s = acc_s + d.reshape(CHUNK_ROWS // SUBLANE, SUBLANE, LANE).sum(axis=0)
        acc_c = acc_c + w.reshape(CHUNK_ROWS // SUBLANE, SUBLANE, LANE).sum(axis=0)
        return acc_s, acc_c

    def interior_body(c, carry):
        return chunk(pl.multiple_of(c * CHUNK_ROWS, CHUNK_ROWS), carry)

    def full_block():
        s, c = jax.lax.fori_loop(0, n_chunks, interior_body, (zero, zero), unroll=True)
        sum_ref[0, :, :] = s
        cnt_ref[0, :, :] = c

    def tail_block():
        last_start = (num_blocks - 1) * block_rows
        rows_left = valid_rows - last_start
        n_full = rows_left // CHUNK_ROWS
        carry = (zero, zero)
        if n_full:
            carry = jax.lax.fori_loop(0, n_full, interior_body, carry, unroll=True)
        if rows_left % CHUNK_ROWS:
            carry = chunk(n_full * CHUNK_ROWS, carry, row0=last_start + n_full * CHUNK_ROWS)
        sum_ref[0, :, :] = carry[0]
        cnt_ref[0, :, :] = carry[1]

    if valid_rows % block_rows == 0:
        full_block()
    elif num_blocks == 1:
        tail_block()
    else:
        last = num_blocks - 1
        pl.when(pl.program_id(0) != last)(full_block)
        pl.when(pl.program_id(0) == last)(tail_block)


def _compiler_params():
    return pltpu.CompilerParams(
        dimension_semantics=("parallel",),
        vmem_limit_bytes=VMEM_LIMIT_BYTES,
    )


@jax.jit
def _l1_loss_nomask(gt, predict):
    n = gt.size  # static under jit
    g2, p2 = _to_2d(gt), _to_2d(predict)
    rows = g2.shape[0]
    br = _block_rows(rows)
    nblk = pl.cdiv(rows, br)
    in_spec = pl.BlockSpec((br, LANE), lambda i: (i, 0))
    out_spec = pl.BlockSpec((1, SUBLANE, LANE), lambda i: (i, 0, 0))
    partial = pl.pallas_call(
        functools.partial(_l1_sum_kernel, block_rows=br, valid_rows=rows),
        out_shape=jax.ShapeDtypeStruct((nblk, SUBLANE, LANE), jnp.float32),
        grid=(nblk,),
        in_specs=[in_spec, in_spec],
        out_specs=out_spec,
        compiler_params=_compiler_params(),
    )(g2, p2)
    return jnp.sum(partial) / jnp.float32(n)


@jax.jit
def _l1_loss_masked(gt, predict, mask):
    g2, p2 = _to_2d(gt), _to_2d(predict)
    m = mask if mask.dtype == jnp.int8 else mask.astype(jnp.int8)  # keep mask 1 byte/elem
    m2 = _to_2d(m)
    rows = g2.shape[0]
    br = _block_rows(rows)
    nblk = pl.cdiv(rows, br)
    in_spec = pl.BlockSpec((br, LANE), lambda i: (i, 0))
    out_spec = pl.BlockSpec((1, SUBLANE, LANE), lambda i: (i, 0, 0))
    s, c = pl.pallas_call(
        functools.partial(_l1_masked_kernel, block_rows=br, valid_rows=rows),
        out_shape=(
            jax.ShapeDtypeStruct((nblk, SUBLANE, LANE), jnp.float32),
            jax.ShapeDtypeStruct((nblk, SUBLANE, LANE), jnp.float32),
        ),
        grid=(nblk,),
        in_specs=[in_spec, in_spec, in_spec],
        out_specs=(out_spec, out_spec),
        compiler_params=_compiler_params(),
    )(g2, p2, m2)
    # All-False mask -> 0/0 = NaN, same as torch.nn.L1Loss on an empty selection.
    return jnp.sum(s) / jnp.sum(c)


def l1_loss(gt, predict, mask=None):
    """Pallas equivalent of L1LossFunction.forward(gt, predict, mask)."""
    if mask is None:
        return _l1_loss_nomask(gt, predict)
    return _l1_loss_masked(gt, predict, mask)


if __name__ == "__main__":
    key = jax.random.PRNGKey(0)
    k1, k2, k3 = jax.random.split(key, 3)

    # Small NCHW-like shapes: batch=2, channels=4, spatial=16x16.
    shape = (2, 4, 16, 16)
    gt = jax.random.normal(k1, shape, dtype=jnp.float32)
    predict = jax.random.normal(k2, shape, dtype=jnp.float32)
    mask = jax.random.bernoulli(k3, p=0.5, shape=shape)

    # No-mask path.
    loss = jax.block_until_ready(l1_loss(gt, predict))
    ref = jnp.mean(jnp.abs(gt - predict))
    assert jnp.allclose(loss, ref, rtol=1e-5, atol=1e-6), (loss, ref)

    # Masked path (boolean-index semantics == weighted mean over selected elems).
    loss_m = jax.block_until_ready(l1_loss(gt, predict, mask))
    mf = mask.astype(jnp.float32)
    ref_m = jnp.sum(jnp.abs(gt - predict) * mf) / jnp.sum(mf)
    assert jnp.allclose(loss_m, ref_m, rtol=1e-5, atol=1e-6), (loss_m, ref_m)

    # Odd size (not a multiple of 128) exercises the ragged tail / in-kernel tail mask.
    shape2 = (3, 5, 7)
    ga = jax.random.normal(k1, shape2, dtype=jnp.float32)
    pa = jax.random.normal(k2, shape2, dtype=jnp.float32)
    ma = jax.random.bernoulli(k3, p=0.5, shape=shape2)
    l2 = jax.block_until_ready(l1_loss(ga, pa))
    assert jnp.allclose(l2, jnp.mean(jnp.abs(ga - pa)), rtol=1e-5, atol=1e-6), l2
    l2m = jax.block_until_ready(l1_loss(ga, pa, ma))
    mf2 = ma.astype(jnp.float32)
    ref2m = jnp.sum(jnp.abs(ga - pa) * mf2) / jnp.sum(mf2)
    assert jnp.allclose(l2m, ref2m, rtol=1e-5, atol=1e-6), (l2m, ref2m)

    print("KERNEL_OK")
</pallas_src>

<mosaic_0001>
module attributes {stable_mosaic.version = 11 : i64} {
  func.func @_l1_sum_kernel(%arg0: i32, %arg1: memref<256x128xf32, #tpu.memory_space<vmem>>, %arg2: memref<256x128xf32, #tpu.memory_space<vmem>>, %arg3: memref<1x8x128xf32, #tpu.memory_space<vmem>>) attributes {dimension_semantics = [#tpu.dimension_semantics<parallel>], iteration_bounds = array<i64: 1>, scalar_prefetch = 0 : i64, scratch_operands = 0 : i64, tpu.core_type = #tpu.core_type<tc>, window_params = [{transform_indices = @transform_0, window_bounds = array<i64: 256, 128>}, {transform_indices = @transform_1, window_bounds = array<i64: 256, 128>}, {transform_indices = @transform_2, window_bounds = array<i64: 1, 8, 128>}]} {
    %cst = arith.constant 0.000000e+00 : f32
    %0 = vector.broadcast %cst : f32 to vector<8x128xf32>
    %c0 = arith.constant 0 : index
    %c0_0 = arith.constant 0 : index
    %1 = vector.load %arg1[%c0, %c0_0] : memref<256x128xf32, #tpu.memory_space<vmem>>, vector<256x128xf32>
    %c0_1 = arith.constant 0 : index
    %c0_2 = arith.constant 0 : index
    %2 = vector.load %arg2[%c0_1, %c0_2] : memref<256x128xf32, #tpu.memory_space<vmem>>, vector<256x128xf32>
    %3 = arith.subf %1, %2 : vector<256x128xf32>
    %4 = math.absf %3 : vector<256x128xf32>
    %5 = tpu.iota {dimensions = array<i32: 0>} : vector<256x128xi32>
    %c0_i32 = arith.constant 0 : i32
    %6 = vector.broadcast %c0_i32 : i32 to vector<256x128xi32>
    %7 = arith.addi %6, %5 : vector<256x128xi32>
    %c16_i32 = arith.constant 16 : i32
    %8 = vector.broadcast %c16_i32 : i32 to vector<256x128xi32>
    %9 = arith.cmpi slt, %7, %8 : vector<256x128xi32>
    %cst_3 = arith.constant 0.000000e+00 : f32
    %10 = vector.broadcast %cst_3 : f32 to vector<256x128xf32>
    %11 = arith.select %9, %4, %10 : vector<256x128xi1>, vector<256x128xf32>
    %12 = vector.shape_cast %11 : vector<256x128xf32> to vector<32x8x128xf32>
    %cst_4 = arith.constant dense<0.000000e+00> : vector<8x128xf32>
    %13 = vector.multi_reduction <add>, %12, %cst_4 [0] : vector<32x8x128xf32> to vector<8x128xf32>
    %14 = arith.addf %0, %13 : vector<8x128xf32>
    %c0_5 = arith.constant 0 : index
    %c0_6 = arith.constant 0 : index
    %c0_7 = arith.constant 0 : index
    %15 = vector.load %arg3[%c0_5, %c0_6, %c0_7] : memref<1x8x128xf32, #tpu.memory_space<vmem>>, vector<1x8x128xf32>
    %16 = vector.shape_cast %15 : vector<1x8x128xf32> to vector<8x128xf32>
    %17 = vector.shape_cast %14 : vector<8x128xf32> to vector<1x8x128xf32>
    tpu.vector_store %arg3[%c0_5, %c0_6, %c0_7], %17 {strides = array<i32>} : memref<1x8x128xf32, #tpu.memory_space<vmem>>, vector<1x8x128xf32>,
    return
  }
  func.func @transform_0(%arg0: i32) -> (i32, i32) {
    %c0_i32 = arith.constant 0 : i32
    %c0_i32_0 = arith.constant 0 : i32
    return %arg0, %c0_i32 : i32, i32
  }
  func.func @transform_1(%arg0: i32) -> (i32, i32) {
    %c0_i32 = arith.constant 0 : i32
    %c0_i32_0 = arith.constant 0 : i32
    return %arg0, %c0_i32 : i32, i32
  }
  func.func @transform_2(%arg0: i32) -> (i32, i32, i32) {
    %c0_i32 = arith.constant 0 : i32
    %c0_i32_0 = arith.constant 0 : i32
    %c0_i32_1 = arith.constant 0 : i32
    return %arg0, %c0_i32, %c0_i32_0 : i32, i32, i32
  }
}

</mosaic_0001>

<bundles_post_ra>
// kernel: _l1_loss_nomask.1
= control target key start
LH: loop header
LB: loop body
LE: loop exit
PB: predicated region body
PF: predicated region fallthrough
CT: control target
= control target key end

     0   :  { %s303_s0 = inlined_call_operand.vmem [shape: f32[16,128], index: 0, kind: input, shape index: {}]   ;;  %s304_s1 = inlined_call_operand.vmem [shape: f32[16,128], index: 1, kind: input, shape index: {}]   ;;  %s305_s2 = inlined_call_operand.vmem [shape: f32[1,8,128], index: 2, kind: output, shape index: {}]  }
   0x1   :  { %v11_v0 = vld [vmem:[%s303_s0] sm:$0xff]  ;;  %v12_v1 = vld [vmem:[%s303_s0 + $0x8] sm:$0xff] }
   0x2   :  { %v43_v2 = vld [vmem:[%s304_s1] sm:$0xff]  ;;  %v44_v3 = vld [vmem:[%s304_s1 + $0x8] sm:$0xff] }
   0x3   :  { %v75_v4 = vsub.f32 %v11_v0, %v43_v2  ;;  %v76_v5 = vsub.f32 %v12_v1, %v44_v3 }
   0x5   :  { %v107_v6 = vand.u32 2147483647, %v75_v4  ;;  %v108_v7 = vand.u32 2147483647, %v76_v5 }
   0x7   :  { %v236_v8 = vadd.f32 %v108_v7, %v107_v6 }
   0x9   :  { %268 = vst [vmem:[%s305_s2] sm:$0xff] %v236_v8 }

</bundles_post_ra>
